<compile_context>
chip_gen: v6e
topology: v6e:2x2x1
jax: 0.10.0
libtpu: 0.0.40
codegen_flags: <defaults>
</compile_context>

<pallas_src>
import functools

import jax
import jax.numpy as jnp
from jax.experimental import pallas as pl
from jax.experimental.pallas import tpu as pltpu


def _round_up(x, m):
    return (x + m - 1) // m * m


def _pick_width(n):
    """Largest lane width from {2048,...,128} that divides n (0 if none)."""
    for w in (2048, 1024, 512, 256, 128):
        if n % w == 0:
            return w
    return 0


@functools.lru_cache(maxsize=None)
def _hw_config():
    """Returns (max_block_bytes, vmem_limit_bytes, tensorcores_per_device)."""
    vmem_cap = 0
    try:
        vmem_cap = int(pltpu.get_tpu_info().vmem_capacity_bytes)
    except Exception:
        vmem_cap = 0
    two_tc = False
    try:
        kind = jax.devices()[0].device_kind.lower()
        two_tc = any(tag in kind for tag in ("v4", "v7", "tpu7"))
    except Exception:
        two_tc = False
    if vmem_cap >= 96 * 1024 * 1024:
        # 128-MiB-VMEM class (v5e/v6e): larger 4 MiB streaming blocks.
        return 4 * 1024 * 1024, 80 * 1024 * 1024, (2 if two_tc else 1)
    # 64-MiB-VMEM class (v7x) or unknown: conservative 2 MiB blocks.
    return 2 * 1024 * 1024, 40 * 1024 * 1024, (2 if two_tc else 1)


def _bbox_transform_kernel(ms_ref, boxes_ref, deltas_ref, out_ref):
    # boxes_ref / deltas_ref / out_ref: (R, W) f32 blocks; lanes interleaved
    # [x1, y1, x2, y2, x1, ...] per box (W % 4 == 0, boxes never straddle rows).
    # ms_ref: (2, W) f32: row 0 = per-lane mean, row 1 = per-lane std.
    b = boxes_ref[...]
    d = deltas_ref[...]
    W = b.shape[-1]

    mean_row = ms_ref[0:1, :]            # (1, W)
    std_row = ms_ref[1:2, :]             # (1, W)

    # Per-lane metadata on a single (1, W) row (broadcasts over sublanes).
    lane = jax.lax.broadcasted_iota(jnp.int32, (1, W), 1)
    is_xy = (lane & 2) == 0                                    # x1/y1 lanes
    sign_row = jnp.where(is_xy, jnp.float32(-1.0), jnp.float32(1.0))
    # Partner-lane swap within each aligned 4-lane box group (lane j <-> j^2),
    # built from two lane rotations; the per-lane pick is derived from the same
    # rotation applied to the lane iota, so it is independent of the roll
    # direction convention and no selected value ever crosses a box boundary.
    use_a = pltpu.roll(lane, shift=2, axis=1) == (lane ^ 2)    # (1, W) bool

    def swap(x):
        return jnp.where(use_a,
                         pltpu.roll(x, shift=2, axis=1),
                         pltpu.roll(x, shift=W - 2, axis=1))

    b_sw = swap(b)                        # opposite corner per lane
    size = (b - b_sw) * sign_row          # width on x lanes, height on y lanes
    ctr = 0.5 * (b + b_sw)                # ctr_x / ctr_y on every lane

    dd = d * std_row + mean_row           # [dx, dy, dw, dh] lanes
    # m: center shift on x1/y1 lanes, half extent on x2/y2 lanes; the partner
    # lane contributes the other term through one swapped, sign-weighted add.
    m = jnp.where(is_xy, dd * size, 0.5 * jnp.exp(dd) * size)
    out_ref[...] = ctr + m + sign_row * swap(m)


def _decode_flat_pallas(boxes_flat, deltas_flat, mean, std):
    """Pallas path for a flat stream whose length is a multiple of 128."""
    L = boxes_flat.shape[0]
    W = _pick_width(L)
    assert W > 0
    rows = L // W

    max_block_bytes, vmem_limit, n_tc = _hw_config()
    max_block_rows = max(8, (max_block_bytes // (4 * W)) // 8 * 8)

    if n_tc >= 2:
        # Even number of blocks so both TensorCores (megacore) get equal work.
        target_blocks = max(2, 2 * pl.cdiv(rows, 2 * max_block_rows))
    else:
        target_blocks = pl.cdiv(rows, max_block_rows)
    block_rows = min(rows, _round_up(pl.cdiv(rows, target_blocks), 8))
    nblocks = pl.cdiv(rows, block_rows)
    if nblocks == 1:
        block_rows = rows   # full-extent block: no (8,128) constraint, no OOB

    boxes_k = boxes_flat.reshape(rows, W)      # pure bitcast, no data movement
    deltas_k = deltas_flat.reshape(rows, W)

    comp = jnp.arange(W, dtype=jnp.int32) % 4
    ms = jnp.stack([mean[comp], std[comp]], axis=0)            # (2, W)

    out = pl.pallas_call(
        _bbox_transform_kernel,
        out_shape=jax.ShapeDtypeStruct((rows, W), jnp.float32),
        grid=(nblocks,),
        in_specs=[
            pl.BlockSpec((2, W), lambda i: (0, 0)),            # mean/std rows
            pl.BlockSpec((block_rows, W), lambda i: (i, 0)),   # boxes
            pl.BlockSpec((block_rows, W), lambda i: (i, 0)),   # deltas
        ],
        out_specs=pl.BlockSpec((block_rows, W), lambda i: (i, 0)),
        compiler_params=pltpu.CompilerParams(
            dimension_semantics=("parallel",),
            vmem_limit_bytes=vmem_limit,
        ),
    )(ms, boxes_k, deltas_k)
    return out.reshape(L)


def _decode_flat_ref(boxes_flat, deltas_flat, mean, std):
    """Plain-XLA decode for a (tiny) flat tail; length is a multiple of 4."""
    b = boxes_flat.reshape(-1, 4)
    d = deltas_flat.reshape(-1, 4) * std[None, :] + mean[None, :]
    w = b[:, 2] - b[:, 0]
    h = b[:, 3] - b[:, 1]
    cx = b[:, 0] + 0.5 * w
    cy = b[:, 1] + 0.5 * h
    pcx = cx + d[:, 0] * w
    pcy = cy + d[:, 1] * h
    pw = jnp.exp(d[:, 2]) * w
    ph = jnp.exp(d[:, 3]) * h
    out = jnp.stack([pcx - 0.5 * pw, pcy - 0.5 * ph,
                     pcx + 0.5 * pw, pcy + 0.5 * ph], axis=1)
    return out.reshape(-1)


@jax.jit
def bbox_transform(boxes, deltas, mean, std):
    """JAX/Pallas equivalent of BBoxTransform.forward.

    boxes:  (B, N, 4) float32  [x1, y1, x2, y2]
    deltas: (B, N, 4) float32  [dx, dy, dw, dh]
    mean, std: (4,) float32
    returns (B, N, 4) float32
    """
    B, N, C = boxes.shape
    assert C == 4 and deltas.shape == (B, N, 4)
    L = B * N * 4

    boxes_flat = boxes.astype(jnp.float32).reshape(L)
    deltas_flat = deltas.astype(jnp.float32).reshape(L)
    mean = mean.astype(jnp.float32)
    std = std.astype(jnp.float32)

    L_bulk = (L // 128) * 128   # largest prefix filling whole 128-lane rows
    if L_bulk == L:
        out = _decode_flat_pallas(boxes_flat, deltas_flat, mean, std)
    elif L_bulk == 0:
        out = _decode_flat_ref(boxes_flat, deltas_flat, mean, std)
    else:
        # Rare ragged case: Pallas on the bulk, plain XLA on the <32-box tail.
        bulk = _decode_flat_pallas(boxes_flat[:L_bulk], deltas_flat[:L_bulk],
                                   mean, std)
        tail = _decode_flat_ref(boxes_flat[L_bulk:], deltas_flat[L_bulk:],
                                mean, std)
        out = jnp.concatenate([bulk, tail], axis=0)
    return out.reshape(B, N, 4)


def _reference(boxes, deltas, mean, std):
    widths = boxes[:, :, 2] - boxes[:, :, 0]
    heights = boxes[:, :, 3] - boxes[:, :, 1]
    ctr_x = boxes[:, :, 0] + 0.5 * widths
    ctr_y = boxes[:, :, 1] + 0.5 * heights
    dx = deltas[:, :, 0] * std[0] + mean[0]
    dy = deltas[:, :, 1] * std[1] + mean[1]
    dw = deltas[:, :, 2] * std[2] + mean[2]
    dh = deltas[:, :, 3] * std[3] + mean[3]
    pred_ctr_x = ctr_x + dx * widths
    pred_ctr_y = ctr_y + dy * heights
    pred_w = jnp.exp(dw) * widths
    pred_h = jnp.exp(dh) * heights
    return jnp.stack(
        [pred_ctr_x - 0.5 * pred_w, pred_ctr_y - 0.5 * pred_h,
         pred_ctr_x + 0.5 * pred_w, pred_ctr_y + 0.5 * pred_h], axis=2)


def _make_inputs(key, B, N):
    k1, k2, k3 = jax.random.split(key, 3)
    xy = jax.random.uniform(k1, (B, N, 2), dtype=jnp.float32) * 100.0
    wh = jax.random.uniform(k2, (B, N, 2), dtype=jnp.float32) * 50.0 + 1.0
    boxes = jnp.concatenate([xy, xy + wh], axis=2)
    deltas = jax.random.normal(k3, (B, N, 4), dtype=jnp.float32)
    return boxes, deltas


if __name__ == "__main__":
    # Deterministic parameters matching BBoxTransform.__init__ defaults.
    mean = jnp.array([0.0, 0.0, 0.0, 0.0], dtype=jnp.float32)
    std = jnp.array([0.1, 0.1, 0.2, 0.2], dtype=jnp.float32)

    key = jax.random.PRNGKey(0)
    keys = jax.random.split(key, 3)

    # (B, N): tiny exact-fit case, ragged case (bulk + tail), lane-dense case.
    cases = [(2, 16), (2, 5000), (2, 8192)]
    for (B, N), k in zip(cases, keys):
        boxes, deltas = _make_inputs(k, B, N)
        out = jax.block_until_ready(bbox_transform(boxes, deltas, mean, std))
        ref = _reference(boxes, deltas, mean, std)
        assert out.shape == (B, N, 4)
        assert jnp.allclose(out, ref, atol=1e-4, rtol=1e-5)

    print("KERNEL_OK")
</pallas_src>

<mosaic_0001>
module attributes {stable_mosaic.version = 11 : i64} {
  func.func @_bbox_transform_kernel(%arg0: i32, %arg1: memref<2x128xf32, #tpu.memory_space<vmem>>, %arg2: memref<1x128xf32, #tpu.memory_space<vmem>>, %arg3: memref<1x128xf32, #tpu.memory_space<vmem>>, %arg4: memref<1x128xf32, #tpu.memory_space<vmem>>) attributes {dimension_semantics = [#tpu.dimension_semantics<parallel>], iteration_bounds = array<i64: 1>, scalar_prefetch = 0 : i64, scratch_operands = 0 : i64, tpu.core_type = #tpu.core_type<tc>, window_params = [{pipeline_mode = #tpu.pipeline_mode<synchronous>, transform_indices = @transform_0, window_bounds = array<i64: 2, 128>}, {transform_indices = @transform_1, window_bounds = array<i64: 1, 128>}, {transform_indices = @transform_2, window_bounds = array<i64: 1, 128>}, {transform_indices = @transform_3, window_bounds = array<i64: 1, 128>}]} {
    %c0 = arith.constant 0 : index
    %c0_0 = arith.constant 0 : index
    %0 = vector.load %arg2[%c0, %c0_0] : memref<1x128xf32, #tpu.memory_space<vmem>>, vector<1x128xf32>
    %c0_1 = arith.constant 0 : index
    %c0_2 = arith.constant 0 : index
    %1 = vector.load %arg3[%c0_1, %c0_2] : memref<1x128xf32, #tpu.memory_space<vmem>>, vector<1x128xf32>
    %c0_3 = arith.constant 0 : index
    %c0_4 = arith.constant 0 : index
    %2 = vector.load %arg1[%c0_3, %c0_4] : memref<2x128xf32, #tpu.memory_space<vmem>>, vector<1x128xf32>
    %c1 = arith.constant 1 : index
    %c0_5 = arith.constant 0 : index
    %3 = vector.load %arg1[%c1, %c0_5] : memref<2x128xf32, #tpu.memory_space<vmem>>, vector<1x128xf32>
    %4 = tpu.iota {dimensions = array<i32: 1>} : vector<1x128xi32>
    %c2_i32 = arith.constant 2 : i32
    %5 = vector.broadcast %c2_i32 : i32 to vector<1x128xi32>
    %6 = arith.andi %4, %5 : vector<1x128xi32>
    %c0_i32 = arith.constant 0 : i32
    %7 = vector.broadcast %c0_i32 : i32 to vector<1x128xi32>
    %8 = arith.cmpi eq, %6, %7 : vector<1x128xi32>
    %cst = arith.constant -1.000000e+00 : f32
    %cst_6 = arith.constant 1.000000e+00 : f32
    %9 = vector.broadcast %cst : f32 to vector<1x128xf32>
    %10 = vector.broadcast %cst_6 : f32 to vector<1x128xf32>
    %11 = arith.select %8, %9, %10 : vector<1x128xi1>, vector<1x128xf32>
    %c2_i32_7 = arith.constant 2 : i32
    %12 = tpu.dynamic_rotate %4 by %c2_i32_7 dim 1 : vector<1x128xi32>, i32 -> vector<1x128xi32>
    %c2_i32_8 = arith.constant 2 : i32
    %13 = vector.broadcast %c2_i32_8 : i32 to vector<1x128xi32>
    %14 = arith.xori %4, %13 : vector<1x128xi32>
    %15 = arith.cmpi eq, %12, %14 : vector<1x128xi32>
    %c2_i32_9 = arith.constant 2 : i32
    %16 = tpu.dynamic_rotate %0 by %c2_i32_9 dim 1 : vector<1x128xf32>, i32 -> vector<1x128xf32>
    %c126_i32 = arith.constant 126 : i32
    %17 = tpu.dynamic_rotate %0 by %c126_i32 dim 1 : vector<1x128xf32>, i32 -> vector<1x128xf32>
    %18 = arith.select %15, %16, %17 : vector<1x128xi1>, vector<1x128xf32>
    %19 = arith.subf %0, %18 : vector<1x128xf32>
    %20 = arith.mulf %19, %11 : vector<1x128xf32>
    %21 = arith.addf %0, %18 : vector<1x128xf32>
    %cst_10 = arith.constant 5.000000e-01 : f32
    %22 = vector.broadcast %cst_10 : f32 to vector<1x128xf32>
    %23 = arith.mulf %22, %21 : vector<1x128xf32>
    %24 = arith.mulf %1, %3 : vector<1x128xf32>
    %25 = arith.addf %24, %2 : vector<1x128xf32>
    %26 = arith.mulf %25, %20 : vector<1x128xf32>
    %27 = math.exp %25 : vector<1x128xf32>
    %cst_11 = arith.constant 5.000000e-01 : f32
    %28 = vector.broadcast %cst_11 : f32 to vector<1x128xf32>
    %29 = arith.mulf %28, %27 : vector<1x128xf32>
    %30 = arith.mulf %29, %20 : vector<1x128xf32>
    %31 = arith.select %8, %26, %30 : vector<1x128xi1>, vector<1x128xf32>
    %32 = arith.addf %23, %31 : vector<1x128xf32>
    %c2_i32_12 = arith.constant 2 : i32
    %33 = tpu.dynamic_rotate %31 by %c2_i32_12 dim 1 : vector<1x128xf32>, i32 -> vector<1x128xf32>
    %c126_i32_13 = arith.constant 126 : i32
    %34 = tpu.dynamic_rotate %31 by %c126_i32_13 dim 1 : vector<1x128xf32>, i32 -> vector<1x128xf32>
    %35 = arith.select %15, %33, %34 : vector<1x128xi1>, vector<1x128xf32>
    %36 = arith.mulf %11, %35 : vector<1x128xf32>
    %37 = arith.addf %32, %36 : vector<1x128xf32>
    %c0_14 = arith.constant 0 : index
    %c0_15 = arith.constant 0 : index
    %38 = vector.load %arg4[%c0_14, %c0_15] : memref<1x128xf32, #tpu.memory_space<vmem>>, vector<1x128xf32>
    tpu.vector_store %arg4[%c0_14, %c0_15], %37 {strides = array<i32>} : memref<1x128xf32, #tpu.memory_space<vmem>>, vector<1x128xf32>,
    return
  }
  func.func @transform_0(%arg0: i32) -> (i32, i32) {
    %c0_i32 = arith.constant 0 : i32
    %c0_i32_0 = arith.constant 0 : i32
    %c0_i32_1 = arith.constant 0 : i32
    return %c0_i32, %c0_i32_0 : i32, i32
  }
  func.func @transform_1(%arg0: i32) -> (i32, i32) {
    %c0_i32 = arith.constant 0 : i32
    %c0_i32_0 = arith.constant 0 : i32
    return %arg0, %c0_i32 : i32, i32
  }
  func.func @transform_2(%arg0: i32) -> (i32, i32) {
    %c0_i32 = arith.constant 0 : i32
    %c0_i32_0 = arith.constant 0 : i32
    return %arg0, %c0_i32 : i32, i32
  }
  func.func @transform_3(%arg0: i32) -> (i32, i32) {
    %c0_i32 = arith.constant 0 : i32
    %c0_i32_0 = arith.constant 0 : i32
    return %arg0, %c0_i32 : i32, i32
  }
}

</mosaic_0001>

<bundles_post_ra>
// kernel: bbox_transform.1
= control target key start
LH: loop header
LB: loop body
LE: loop exit
PB: predicated region body
PF: predicated region fallthrough
CT: control target
= control target key end

     0   :  { %v18_v0 = vlaneseq  ;;  %s62_s14 = smov 126   ;;  %s63_s15 = smov 2   ;;  %v64_v17 = vmov 1.0   ;;  %s113_s1 = inlined_call_operand.vmem [shape: f32[1,128], index: 1, kind: input, shape index: {}]   ;;  %s114_s0 = inlined_call_operand.vmem [shape: f32[2,128], index: 0, kind: input, shape index: {}]   ;;  %s115_s2 = inlined_call_operand.vmem [shape: f32[1,128], index: 2, kind: input, shape index: {}]   ;;  %s116_s3 = inlined_call_operand.vmem [shape: f32[1,128], index: 3, kind: output, shape index: {}]  }
   0x1   :  { %v14_v1 = vld [vmem:[%s113_s1] sm:$0x1]  ;;  %v17_v4 = vld [vmem:[%s114_s0 + $0x1] sm:$0x1] }
   0x2   :  { %v19_v2 = vand.u32 127, %v18_v0  ;;  %29 = vrot.lane.b32.xlu1 %v14_v1, %s62_s14  ;;  %v15_v3 = vld [vmem:[%s115_s2] sm:$0x1] }
   0x3   :  { %v36_v5 = vmul.f32 %v17_v4, %v15_v3  ;;  %v16_v6 = vld [vmem:[%s114_s0] sm:$0x1] }
   0x4   :  { %23 = vrot.lane.b32.xlu0 %v19_v2, %s63_s15  ;;  %v20_v9 = vand.u32 2, %v19_v2  ;;  %v25_v11 = vxor.u32 2, %v19_v2 }
   0x5   :  { %v37_v7 = vadd.f32 %v36_v5, %v16_v6 }
   0x6   :  { %vm21_vm0 = vcmp.eq.s32.totalorder %v20_v9, 0 }
   0x7   :  { %v39_v8 = vmul.f32 1.442695, %v37_v7  ;;  %v22_v18 = vsel %vm21_vm0, -1.0, %v64_v17 }
   0x8   :  { %27 = vrot.lane.b32.xlu0 %v14_v1, %s63_s15 }
   0x9   :  { %60 = vpow2.f32 %v39_v8 }
  0x16   :  { %v61_v13 = vpop.eup %60 }
  0x17   :  { %v41_v20 = vmul.f32 0.5, %v61_v13 }
  0x74   :  { %v30_v12 = vpop.permute.xlu1 %29 }
  0x76   :  { %v24_v10 = vpop.permute.xlu0 %23 }
  0x77   :  { %vm100_vm1 = vcmp.eq.s32.totalorder %v24_v10, %v25_v11 }
  0x7a   :  { %v28_v15 = vpop.permute.xlu0 %27 }
  0x7b   :  { %v31_v16 = vsel %vm100_vm1, %v28_v15, %v30_v12 }
  0x7c   :  { %v32_v19 = vsub.f32 %v14_v1, %v31_v16  ;;  %v34_v21 = vadd.f32 %v31_v16, %v14_v1 }
  0x7e   :  { %v33_v22 = vmul.f32 %v32_v19, %v22_v18  ;;  %v35_v25 = vmul.f32 0.5, %v34_v21 }
  0x80   :  { %v38_v23 = vmul.f32 %v37_v7, %v33_v22  ;;  %v42_v24 = vmul.f32 %v41_v20, %v33_v22 }
  0x82   :  { %v43_v26 = vsel %vm21_vm0, %v38_v23, %v42_v24 }
  0x83   :  { %47 = vrot.lane.b32.xlu0 %v43_v26, %s62_s14  ;;  %v44_v27 = vadd.f32 %v43_v26, %v35_v25  ;;  %45 = vrot.lane.b32.xlu1 %v43_v26, %s63_s15 }
  0xf5   :  { %v48_v28 = vpop.permute.xlu0 %47  ;;  %v46_v29 = vpop.permute.xlu1 %45 }
  0xf6   :  { %v49_v30 = vsel %vm100_vm1, %v46_v29, %v48_v28 }
  0xf7   :  { %v50_v31 = vmul.f32 %v49_v30, %v22_v18 }
  0xf9   :  { %v51_v32 = vadd.f32 %v50_v31, %v44_v27 }
  0xfb   :  { %52 = vst [vmem:[%s116_s3] sm:$0x1] %v51_v32 }

</bundles_post_ra>
